<compile_context>
chip_gen: v7x
topology: tpu7x:2x2x1
jax: 0.10.0
libtpu: 0.0.40
codegen_flags: <defaults>
</compile_context>

<pallas_src>
import functools

import jax
import jax.numpy as jnp
from jax import lax
from jax.experimental import pallas as pl
from jax.experimental.pallas import tpu as pltpu


def _linear_kernel(x_ref, wt_ref, b_ref, o_ref):
    """One (i, j, k) grid step of y = x @ W^T + b.

    x_ref:  (tm, tk)  activation tile
    wt_ref: (tk, tn)  pre-transposed weight tile (W^T, padded once at prep)
    b_ref:  (1, tn)   bias tile
    o_ref:  (tm, tn)  f32 output tile, resident across the K axis (accumulator)
    """
    k = pl.program_id(2)

    # Initialize the resident output block with the bias on the first K step.
    @pl.when(k == 0)
    def _():
        o_ref[...] = jnp.broadcast_to(b_ref[...], o_ref.shape).astype(o_ref.dtype)

    # MXU accumulate.  HIGHEST precision => multi-pass bf16 for f32 inputs,
    # matching fp32 nn.Linear to ~1e-6.
    o_ref[...] += jnp.dot(
        x_ref[...],
        wt_ref[...],
        preferred_element_type=jnp.float32,
        precision=lax.Precision.HIGHEST,
    )


def _round_up(x, m):
    return ((x + m - 1) // m) * m


def _largest_divisor_tile(extent, cap, unit=128):
    """Largest multiple of `unit` that divides `extent` and is <= cap."""
    best = unit
    t = unit
    while t <= min(cap, extent):
        if extent % t == 0:
            best = t
        t += unit
    return best


def prepare_linear_params(weight, bias):
    """One-time weight/bias layout prep (do NOT call per forward).

    weight: [out_f, in_f] (PyTorch layout)  ->  wt_p: [K_p, N_p] = padded W^T
    bias:   [out_f]                         ->  b_p:  [1, N_p]
    Padding + transpose here is a single HBM pass at init; the per-call
    wrapper only ever pads the (small) activation.
    """
    out_f, in_f = weight.shape
    K_p = _round_up(in_f, 128)
    N_p = _round_up(out_f, 128)
    wt = jnp.asarray(weight).T  # [in_f, out_f]
    wt_p = jnp.pad(wt, ((0, K_p - in_f), (0, N_p - out_f)))
    b_p = jnp.pad(jnp.asarray(bias), (0, N_p - out_f)).reshape(1, N_p)
    return wt_p, b_p, out_f


@functools.partial(jax.jit, static_argnames=("out_f",))
def linear_forward(x, wt_p, b_p, out_f):
    """y = x @ W^T + b with pre-prepared (wt_p, b_p) from prepare_linear_params.

    x:    [B, in_f]   f32
    wt_p: [K_p, N_p]  f32 (padded W^T)
    b_p:  [1, N_p]    f32 (padded bias)
    """
    B, in_f = x.shape
    K_p, N_p = wt_p.shape
    assert in_f <= K_p, "feature dim mismatch with prepared weight"

    # ---- tile selection (all static under jit) ----
    # M: single block if B fits, else pick the 512/256/128 tile that minimizes
    # padding waste (tie-break: larger tile -> fewer grid steps).
    if B <= 512:
        tm = _round_up(B, 8)
    else:
        tm = min((512, 256, 128), key=lambda t: (_round_up(B, t), -t))
    B_p = _round_up(B, tm)

    tk = _largest_divisor_tile(K_p, 1024)   # reduction tile
    tn = _largest_divisor_tile(N_p, 512)    # output-lane tile

    # Megacore: make sure the parallel (M, N) grid has >= 2 blocks when
    # possible so both v7x TensorCores get work.
    if (B_p // tm) * (N_p // tn) < 2 and N_p >= 256:
        tn = _largest_divisor_tile(N_p, N_p // 2)

    # ---- per-call activation padding only (weight was padded once) ----
    if B_p != B or K_p != in_f:
        x_p = jnp.pad(x, ((0, B_p - B), (0, K_p - in_f)))
    else:
        x_p = x

    grid = (B_p // tm, N_p // tn, K_p // tk)

    # VMEM footprint (double-buffered inputs + resident output), bytes.
    vmem_need = (2 * (tm * tk + tk * tn) + 2 * (tm * tn) + 2 * tn) * 4
    vmem_limit = min(48 * 1024 * 1024, max(32 * 1024 * 1024, 2 * vmem_need))

    cost = pl.CostEstimate(
        flops=2 * B_p * K_p * N_p,
        transcendentals=0,
        bytes_accessed=4 * (B_p * K_p + K_p * N_p + N_p + B_p * N_p),
    )

    out_p = pl.pallas_call(
        _linear_kernel,
        out_shape=jax.ShapeDtypeStruct((B_p, N_p), jnp.float32),
        grid_spec=pltpu.PrefetchScalarGridSpec(
            num_scalar_prefetch=0,
            grid=grid,
            in_specs=[
                pl.BlockSpec((tm, tk), lambda i, j, k: (i, k)),  # x
                pl.BlockSpec((tk, tn), lambda i, j, k: (k, j)),  # W^T
                pl.BlockSpec((1, tn), lambda i, j, k: (0, j)),   # bias
            ],
            out_specs=pl.BlockSpec((tm, tn), lambda i, j, k: (i, j)),
        ),
        compiler_params=pltpu.CompilerParams(
            dimension_semantics=("parallel", "parallel", "arbitrary"),
            vmem_limit_bytes=vmem_limit,
        ),
        cost_estimate=cost,
    )(x_p, wt_p, b_p)

    return out_p[:B, :out_f].astype(x.dtype)


if __name__ == "__main__":
    # Small shapes consistent with torch.nn.Linear(in_features, out_features).
    batch, in_features, out_features = 8, 32, 16

    key = jax.random.PRNGKey(0)
    kx, kw, kb = jax.random.split(key, 3)

    x = jax.random.normal(kx, (batch, in_features), dtype=jnp.float32)
    # Deterministic init mimicking nn.Linear's uniform(-1/sqrt(in), 1/sqrt(in)).
    bound = 1.0 / (float(in_features) ** 0.5)
    weight = jax.random.uniform(
        kw, (out_features, in_features), minval=-bound, maxval=bound,
        dtype=jnp.float32)
    bias = jax.random.uniform(
        kb, (out_features,), minval=-bound, maxval=bound, dtype=jnp.float32)

    # One-time parameter prep (analogous to module construction).
    wt_p, b_p, out_f = prepare_linear_params(weight, bias)

    out = linear_forward(x, wt_p, b_p, out_f)
    out = jax.block_until_ready(out)

    # Reference check in plain JAX (same semantics as torch: x @ W^T + b).
    ref = x @ weight.T + bias
    assert out.shape == (batch, out_features)
    assert jnp.allclose(out, ref, atol=1e-5, rtol=1e-5)

    print("KERNEL_OK")
</pallas_src>

<mosaic_0001>
module attributes {stable_mosaic.version = 11 : i64} {
  func.func @_linear_kernel(%arg0: i32, %arg1: i32, %arg2: i32, %arg3: memref<8x128xf32, #tpu.memory_space<vmem>>, %arg4: memref<128x128xf32, #tpu.memory_space<vmem>>, %arg5: memref<1x128xf32, #tpu.memory_space<vmem>>, %arg6: memref<8x128xf32, #tpu.memory_space<vmem>>) attributes {dimension_semantics = [#tpu.dimension_semantics<parallel>, #tpu.dimension_semantics<parallel>, #tpu.dimension_semantics<arbitrary>], iteration_bounds = array<i64: 1, 1, 1>, scalar_prefetch = 0 : i64, scratch_operands = 0 : i64, tpu.core_type = #tpu.core_type<tc>, window_params = [{transform_indices = @transform_0, window_bounds = array<i64: 8, 128>}, {transform_indices = @transform_1, window_bounds = array<i64: 128, 128>}, {transform_indices = @transform_2, window_bounds = array<i64: 1, 128>}, {transform_indices = @transform_3, window_bounds = array<i64: 8, 128>}]} {
    %c0_i32 = arith.constant 0 : i32
    %0 = arith.cmpi eq, %arg2, %c0_i32 : i32
    %1 = arith.extui %0 : i1 to i32
    %c0_i32_0 = arith.constant 0 : i32
    %2 = arith.cmpi ne, %1, %c0_i32_0 : i32
    scf.if %2 {
      %c0_8 = arith.constant 0 : index
      %c0_9 = arith.constant 0 : index
      %9 = vector.load %arg5[%c0_8, %c0_9] : memref<1x128xf32, #tpu.memory_space<vmem>>, vector<1x128xf32>
      %10 = vector.shape_cast %9 : vector<1x128xf32> to vector<1x128xf32>
      %11 = vector.broadcast %10 : vector<1x128xf32> to vector<8x128xf32>
      %c0_10 = arith.constant 0 : index
      %c0_11 = arith.constant 0 : index
      %12 = vector.load %arg6[%c0_10, %c0_11] : memref<8x128xf32, #tpu.memory_space<vmem>>, vector<8x128xf32>
      tpu.vector_store %arg6[%c0_10, %c0_11], %11 {strides = array<i32>} : memref<8x128xf32, #tpu.memory_space<vmem>>, vector<8x128xf32>,
    } else {
    }
    %c0 = arith.constant 0 : index
    %c0_1 = arith.constant 0 : index
    %3 = vector.load %arg6[%c0, %c0_1] : memref<8x128xf32, #tpu.memory_space<vmem>>, vector<8x128xf32>
    %c0_2 = arith.constant 0 : index
    %c0_3 = arith.constant 0 : index
    %4 = vector.load %arg3[%c0_2, %c0_3] : memref<8x128xf32, #tpu.memory_space<vmem>>, vector<8x128xf32>
    %c0_4 = arith.constant 0 : index
    %c0_5 = arith.constant 0 : index
    %5 = vector.load %arg4[%c0_4, %c0_5] : memref<128x128xf32, #tpu.memory_space<vmem>>, vector<128x128xf32>
    %cst = arith.constant dense<0.000000e+00> : vector<8x128xf32>
    %6 = tpu.matmul %4, %5, %cst {dimension_numbers = #tpu.dot_dimension_numbers<[1], [0], [0], [1], [0, 0, 1, 1], [], []>, precision = #tpu.contract_precision<fp32>} : vector<8x128xf32>, vector<128x128xf32>, vector<8x128xf32> -> vector<8x128xf32>
    %7 = arith.addf %3, %6 : vector<8x128xf32>
    %c0_6 = arith.constant 0 : index
    %c0_7 = arith.constant 0 : index
    %8 = vector.load %arg6[%c0_6, %c0_7] : memref<8x128xf32, #tpu.memory_space<vmem>>, vector<8x128xf32>
    tpu.vector_store %arg6[%c0_6, %c0_7], %7 {strides = array<i32>} : memref<8x128xf32, #tpu.memory_space<vmem>>, vector<8x128xf32>,
    return
  }
  func.func @transform_0(%arg0: i32, %arg1: i32, %arg2: i32) -> (i32, i32) {
    %c0_i32 = arith.constant 0 : i32
    return %arg0, %arg2 : i32, i32
  }
  func.func @transform_1(%arg0: i32, %arg1: i32, %arg2: i32) -> (i32, i32) {
    %c0_i32 = arith.constant 0 : i32
    return %arg2, %arg1 : i32, i32
  }
  func.func @transform_2(%arg0: i32, %arg1: i32, %arg2: i32) -> (i32, i32) {
    %c0_i32 = arith.constant 0 : i32
    %c0_i32_0 = arith.constant 0 : i32
    return %c0_i32, %arg1 : i32, i32
  }
  func.func @transform_3(%arg0: i32, %arg1: i32, %arg2: i32) -> (i32, i32) {
    %c0_i32 = arith.constant 0 : i32
    return %arg0, %arg1 : i32, i32
  }
}

</mosaic_0001>

<bundles_post_ra>
// kernel: linear_forward.1
= control target key start
LH: loop header
LB: loop body
LE: loop exit
PB: predicated region body
PF: predicated region fallthrough
CT: control target
= control target key end

     0   :  { %8 = vsyncpa [#allocation3], 0  ;;  %s1545_s0 = inlined_call_operand.vmem [shape: f32[8,128], index: 0, kind: input, shape index: {}]   ;;  %s1546_s1 = inlined_call_operand.hbm [shape: f32[128,128], index: 1, kind: input, shape index: {}]   ;;  %s1547_s2 = inlined_call_operand.vmem [shape: f32[1,128], index: 2, kind: input, shape index: {}]   ;;  %s1548_s3 = inlined_call_operand.hbm [shape: f32[8,128], index: 3, kind: output, shape index: {}]  }
   0x1   :  { %9 = vsyncpa [#allocation4], 0  ;;  %s1229_s12 = smov [#allocation2]   ;;  %s1181_s16 = scalar_lea.hbm %s1546_s1, 2048 }
   0x2   :  { %s17_s13 = sshll.u32 %s1229_s12, 4  ;;  %p1182_p0 = scmp.ne.s32.totalorder %s1546_s1, %s1181_s16  ;;  %s18_s13 = int_to_ptr.vmem [resolvable:$true] %s17_s13 }
   0x3   :  { %p1185_p1 = scmp.lt.u32.totalorder %s1181_s16, %s1546_s1 }
   0x5   :  { %p1187_p2 = pnand %p1185_p1, %p1182_p0 }
   0x7   :  { %1190 = shalt.err (!%p1187_p2)
}
   0x8   :  { %s1191_s21 = scalar_lea.vmem %s18_s13, 2048  ;;  %p1196_p4 = scmp.lt.s32.totalorder %s18_s13, %s18_s13 }
   0x9   :  { %p1192_p3 = scmp.ne.s32.totalorder %s18_s13, %s1191_s21  ;;  %p1197_p5 = scmp.lt.s32.totalorder %s1191_s21, %s1191_s21 }
   0xb   :  { %p1198_p6 = por %p1197_p5, %p1196_p4 }
   0xd   :  { %p1199_p7 = pnand %p1198_p6, %p1192_p3 }
   0xf   :  { %1202 = shalt.err (!%p1199_p7)
}
  0x10   :  { %s1230_s22 = smov 128   ;;  %s1231_s23 = smov 8  }
  0x11   :  { %23 = dma.hbm_to_vmem [thread:$0]  %s1546_s1, 2048, %s18_s13, [#allocation3], %s1230_s22, %s1230_s22, %s1231_s23  }
  0x12   :  { %1225 = dma.done.wait [#allocation3], 2048  }
  0x13   :  { %1226 = vsyncadd [#allocation3], 4294965248  ;;  %v1232_v0 = vmov 0.0|0.0   ;;  %vm1233_vm0 = vmmov 0   ;;  %v1234_v1 = vmov 0.0   ;;  %v43_v2 = vld [vmem:[#allocation2] sm:$0xff] }
  0x14   :  { %1030 = vmatprep.subr.bf16.mxu0 %v1232_v0  ;;  %1054 = vmatprep.subr.bf16.mxu1 %v1232_v0  ;;  %v44_v3 = vld [vmem:[#allocation2 + $0x8] sm:$0xff]  ;;  %v45_v4 = vld [vmem:[#allocation2 + $0x10] sm:$0xff]  ;;  %v60_v5 = vand.u32 4294901760, %v43_v2  ;;  %v46_v7 = vld [vmem:[#allocation2 + $0x18] sm:$0xff]  ;;  %s1235_s28 = smov [#allocation5]  }
  0x15   :  { %852 = vmatprep.mubr.msk.f32.mxu0 %vm1233_vm0, %v1234_v1  ;;  %887 = vmatprep.mubr.msk.f32.mxu1 %vm1233_vm0, %v1234_v1  ;;  %v63_v6 = vand.u32 4294901760, %v44_v3  ;;  %v66_v8 = vand.u32 4294901760, %v45_v4  ;;  %v47_v9 = vld [vmem:[#allocation2 + $0x20] sm:$0xff]  ;;  %v48_v10 = vld [vmem:[#allocation2 + $0x28] sm:$0xff]  ;;  %v69_v11 = vand.u32 4294901760, %v46_v7  ;;  %v49_v14 = vld [vmem:[#allocation2 + $0x30] sm:$0xff] }
  0x16   :  { %v72_v12 = vand.u32 4294901760, %v47_v9  ;;  %v75_v13 = vand.u32 4294901760, %v48_v10  ;;  %v1276_v16 = vsub.f32 %v43_v2, %v60_v5  ;;  %v50_v19 = vld [vmem:[#allocation2 + $0x38] sm:$0xff]  ;;  %v51_v20 = vld [vmem:[#allocation2 + $0x40] sm:$0xff]  ;;  %v78_v26 = vand.u32 4294901760, %v49_v14  ;;  %v52_v27 = vld [vmem:[#allocation2 + $0x48] sm:$0xff] }
  0x17   :  { %v1274_v15 = vpack.c.bf16 %v63_v6, %v60_v5  ;;  %v1278_v17 = vsub.f32 %v44_v3, %v63_v6  ;;  %v1280_v18 = vsub.f32 %v45_v4, %v66_v8  ;;  %v1282_v21 = vpack.c.bf16 %v69_v11, %v66_v8  ;;  %v53_v40 = vld [vmem:[#allocation2 + $0x50] sm:$0xff]  ;;  %v54_v41 = vld [vmem:[#allocation2 + $0x58] sm:$0xff]  ;;  %v55_v50 = vld [vmem:[#allocation2 + $0x60] sm:$0xff]  ;;  %s708_s29 = sshll.u32 %s1235_s28, 4  ;;  %s709_s29 = int_to_ptr.vmem [resolvable:$true] %s708_s29 }
  0x18   :  { %v1284_v22 = vsub.f32 %v46_v7, %v69_v11  ;;  %v1287_v23 = vsub.f32 %v47_v9, %v72_v12  ;;  %v153_v24 = vand.u32 4294901760, %v1276_v16  ;;  %v81_v28 = vand.u32 4294901760, %v50_v19  ;;  %v56_v59 = vld [vmem:[#allocation2 + $0x68] sm:$0xff]  ;;  %v57_v2 = vld [vmem:[#allocation2 + $0x70] sm:$0xff]  ;;  %v58_v7 = vld [vmem:[#allocation2 + $0x78] sm:$0xff]  ;;  %s1203_s30 = scalar_lea.vmem %s709_s29, 128  ;;  %p1208_p9 = scmp.lt.s32.totalorder %s709_s29, %s709_s29 }
  0x19   :  { %1032 = vmatpush3.bf16.msra.mxu0 %v1274_v15  ;;  %v160_v25 = vand.u32 4294901760, %v1278_v17  ;;  %v167_v29 = vand.u32 4294901760, %v1280_v18  ;;  %v84_v31 = vand.u32 4294901760, %v51_v20  ;;  %v1294_v32 = vsub.f32 %v48_v10, %v75_v13  ;;  %p1204_p8 = scmp.ne.s32.totalorder %s709_s29, %s1203_s30  ;;  %p1209_p10 = scmp.lt.s32.totalorder %s1203_s30, %s1203_s30 }
  0x1a   :  { %1033 = vmatprep.subr.bf16.mxu0 %v1232_v0  ;;  %v174_v30 = vand.u32 4294901760, %v1284_v22  ;;  %v154_v33 = vsub.f32 %v1276_v16, %v153_v24  ;;  %v1302_v35 = vsub.f32 %v49_v14, %v78_v26  ;;  %v1304_v36 = vsub.f32 %v50_v19, %v81_v28 }
  0x1b   :  { %v161_v34 = vsub.f32 %v1278_v17, %v160_v25  ;;  %v168_v37 = vsub.f32 %v1280_v18, %v167_v29  ;;  %v87_v39 = vand.u32 4294901760, %v52_v27  ;;  %v1313_v42 = vpack.c.bf16 %v75_v13, %v72_v12  ;;  %p1210_p11 = por %p1209_p10, %p1208_p9 }
  0x1c   :  { %v175_v38 = vsub.f32 %v1284_v22, %v174_v30  ;;  %v155_v43 = vand.u32 4294901760, %v154_v33  ;;  %v1315_v45 = vpack.c.bf16 %v81_v28, %v78_v26  ;;  %v1318_v48 = vsub.f32 %v51_v20, %v84_v31 }
  0x1d   :  { %1035 = vmatpush3.bf16.msra.mxu0 %v1282_v21  ;;  %v162_v44 = vand.u32 4294901760, %v161_v34  ;;  %v169_v46 = vand.u32 4294901760, %v168_v37  ;;  %v181_v49 = vand.u32 4294901760, %v1287_v23  ;;  %v188_v52 = vand.u32 4294901760, %v1294_v32  ;;  %p1211_p12 = pnand %p1210_p11, %p1204_p8 }
  0x1e   :  { %1036 = vmatprep.subr.bf16.mxu0 %v1232_v0  ;;  %v176_v47 = vand.u32 4294901760, %v175_v38  ;;  %v90_v53 = vand.u32 4294901760, %v53_v40  ;;  %v93_v54 = vand.u32 4294901760, %v54_v41  ;;  %v1322_v55 = vsub.f32 %v52_v27, %v87_v39 }
  0x1f   :  { %v1055_v51 = vpack.c.bf16 %v162_v44, %v155_v43  ;;  %v182_v56 = vsub.f32 %v1287_v23, %v181_v49  ;;  %v195_v57 = vand.u32 4294901760, %v1302_v35  ;;  %v202_v58 = vand.u32 4294901760, %v1304_v36 }
  0x20   :  { %v1058_v60 = vpack.c.bf16 %v176_v47, %v169_v46  ;;  %v1330_v61 = vpack.c.bf16 %v87_v39, %v84_v31  ;;  %v189_v62 = vsub.f32 %v1294_v32, %v188_v52  ;;  %v96_v63 = vand.u32 4294901760, %v55_v50  ;;  %v42_v31 = vld [vmem:[%s1545_s0] sm:$0xff] }
  0x21   :  { %1038 = vmatpush3.bf16.msra.mxu0 %v1313_v42  ;;  %1056 = vmatpush3.bf16.msra.mxu1 %v1055_v51  ;;  %v183_v3 = vand.u32 4294901760, %v182_v56  ;;  %v1337_v4 = vsub.f32 %v53_v40, %v90_v53  ;;  %v196_v5 = vsub.f32 %v1302_v35, %v195_v57  ;;  %v203_v6 = vsub.f32 %v1304_v36, %v202_v58 }
  0x22   :  { %1039 = vmatprep.subr.bf16.mxu0 %v1232_v0  ;;  %1057 = vmatprep.subr.bf16.mxu1 %v1232_v0  ;;  %v190_v8 = vand.u32 4294901760, %v189_v62  ;;  %v1345_v9 = vsub.f32 %v54_v41, %v93_v54  ;;  %v99_v10 = vand.u32 4294901760, %v56_v59  ;;  %v209_v11 = vand.u32 4294901760, %v1318_v48 }
  0x23   :  { %v197_v12 = vand.u32 4294901760, %v196_v5  ;;  %v204_v13 = vand.u32 4294901760, %v203_v6  ;;  %v216_v14 = vand.u32 4294901760, %v1322_v55  ;;  %v102_v19 = vand.u32 4294901760, %v57_v2 }
  0x24   :  { %v1061_v20 = vpack.c.bf16 %v190_v8, %v183_v3  ;;  %v1350_v26 = vsub.f32 %v55_v50, %v96_v63  ;;  %v1352_v27 = vsub.f32 %v56_v59, %v99_v10  ;;  %v105_v28 = vand.u32 4294901760, %v58_v7 }
  0x25   :  { %1041 = vmatpush3.bf16.msra.mxu0 %v1315_v45  ;;  %1059 = vmatpush3.bf16.msra.mxu1 %v1058_v60  ;;  %v210_v33 = vsub.f32 %v1318_v48, %v209_v11  ;;  %v217_v34 = vsub.f32 %v1322_v55, %v216_v14  ;;  %v223_v37 = vand.u32 4294901760, %v1337_v4  ;;  %v1366_v38 = vpack.c.bf16 %v93_v54, %v90_v53 }
  0x26   :  { %1042 = vmatprep.subr.bf16.mxu0 %v1232_v0  ;;  %1060 = vmatprep.subr.bf16.mxu1 %v1232_v0  ;;  %v1064_v39 = vpack.c.bf16 %v204_v13, %v197_v12  ;;  %v1368_v40 = vsub.f32 %v57_v2, %v102_v19  ;;  %v230_v41 = vand.u32 4294901760, %v1345_v9  ;;  %v1374_v47 = vand.u32 4294901760, %v42_v31 }
  0x27   :  { %v211_v43 = vand.u32 4294901760, %v210_v33  ;;  %v218_v44 = vand.u32 4294901760, %v217_v34  ;;  %v224_v46 = vsub.f32 %v1337_v4, %v223_v37  ;;  %v1377_v50 = vsub.f32 %v58_v7, %v105_v28 }
  0x28   :  { %v231_v51 = vsub.f32 %v1345_v9, %v230_v41  ;;  %v237_v53 = vand.u32 4294901760, %v1350_v26  ;;  %v244_v54 = vand.u32 4294901760, %v1352_v27  ;;  %v1387_v56 = vsub.f32 %v42_v31, %v1374_v47 }
  0x29   :  { %1044 = vmatpush3.bf16.msra.mxu0 %v1330_v61  ;;  %1062 = vmatpush3.bf16.msra.mxu1 %v1061_v20  ;;  %v1389_v59 = vpack.c.bf16 %v99_v10, %v96_v63  ;;  %v1067_v60 = vpack.c.bf16 %v218_v44, %v211_v43  ;;  %v225_v62 = vand.u32 4294901760, %v224_v46  ;;  %v251_v3 = vand.u32 4294901760, %v1368_v40 }
  0x2a   :  { %1045 = vmatprep.subr.bf16.mxu0 %v1232_v0  ;;  %1063 = vmatprep.subr.bf16.mxu1 %v1232_v0  ;;  %v142_v2 = vand.u32 4294901760, %v1387_v56  ;;  %v232_v5 = vand.u32 4294901760, %v231_v51  ;;  %v238_v6 = vsub.f32 %v1350_v26, %v237_v53  ;;  %v245_v7 = vsub.f32 %v1352_v27, %v244_v54 }
  0x2b   :  { %v258_v63 = vand.u32 4294901760, %v1377_v50  ;;  %v1403_v8 = vpack.c.bf16 %v105_v28, %v102_v19  ;;  %v252_v12 = vsub.f32 %v1368_v40, %v251_v3  ;;  %v1079_v34 = vpack.c.bf16 %v1278_v17, %v1276_v16 }
  0x2c   :  { %v143_v10 = vsub.f32 %v1387_v56, %v142_v2  ;;  %v1070_v13 = vpack.c.bf16 %v232_v5, %v225_v62  ;;  %v239_v20 = vand.u32 4294901760, %v238_v6  ;;  %v246_v31 = vand.u32 4294901760, %v245_v7 }
  0x2d   :  { %1047 = vmatpush3.bf16.msra.mxu0 %v1366_v38  ;;  %1065 = vmatpush3.bf16.msra.mxu1 %v1064_v39  ;;  %v259_v33 = vsub.f32 %v1377_v50, %v258_v63  ;;  %v253_v39 = vand.u32 4294901760, %v252_v12  ;;  %v1082_v46 = vpack.c.bf16 %v1284_v22, %v1280_v18  ;;  %v1085_v51 = vpack.c.bf16 %v1294_v32, %v1287_v23 }
  0x2e   :  { %1048 = vmatprep.subr.bf16.mxu0 %v1232_v0  ;;  %1066 = vmatprep.subr.bf16.mxu1 %v1232_v0  ;;  %v144_v19 = vand.u32 4294901760, %v143_v10  ;;  %v1073_v28 = vpack.c.bf16 %v246_v31, %v239_v20  ;;  %v1091_v62 = vpack.c.bf16 %v1322_v55, %v1318_v48  ;;  %v1094_v5 = vpack.c.bf16 %v1345_v9, %v1337_v4 }
  0x2f   :  { %v260_v43 = vand.u32 4294901760, %v259_v33  ;;  %v1097_v6 = vpack.c.bf16 %v1352_v27, %v1350_v26  ;;  %v1100_v7 = vpack.c.bf16 %v1377_v50, %v1368_v40  ;;  %v1127_v10 = vpack.c.bf16 %v160_v25, %v153_v24 }
  0x30   :  { %v1130_v12 = vpack.c.bf16 %v174_v30, %v167_v29  ;;  %v1133_v16 = vpack.c.bf16 %v188_v52, %v181_v49  ;;  %v1136_v17 = vpack.c.bf16 %v202_v58, %v195_v57  ;;  %v1145_v18 = vpack.c.bf16 %v244_v54, %v237_v53 }
  0x31   :  { %1050 = vmatpush3.bf16.msra.mxu0 %v1389_v59  ;;  %1068 = vmatpush3.bf16.msra.mxu1 %v1067_v60  ;;  %v1076_v44 = vpack.c.bf16 %v260_v43, %v253_v39  ;;  %v1088_v60 = vpack.c.bf16 %v1304_v36, %v1302_v35 }
  0x32   :  { %1051 = vmatprep.subr.bf16.mxu0 %v1232_v0  ;;  %1069 = vmatprep.subr.bf16.mxu1 %v1232_v0 }
  0x35   :  { %1053 = vmatpush3.bf16.msra.mxu0 %v1403_v8  ;;  %1071 = vmatpush3.bf16.msra.mxu1 %v1070_v13 }
  0x36   :  { %1072 = vmatprep.subr.bf16.mxu1 %v1232_v0  ;;  %1078 = vmatprep.subr.bf16.mxu0 %v1232_v0 }
  0x38   :  { %853 = vmatmul.mubr.f32.vlgmr.msra.gmra.mrb[0].mxu0 %v144_v19 }
  0x39   :  { %1074 = vmatpush3.bf16.msra.mxu1 %v1073_v28  ;;  %1080 = vmatpush3.bf16.msra.mxu0 %v1079_v34 }
  0x3a   :  { %1075 = vmatprep.subr.bf16.mxu1 %v1232_v0  ;;  %1081 = vmatprep.subr.bf16.mxu0 %v1232_v0 }
  0x3b   :  { %922 = vmatprep.mubr.msk.f32.mxu0 %vm1233_vm0, %v1234_v1 }
  0x3d   :  { %1077 = vmatpush3.bf16.msra.mxu1 %v1076_v44  ;;  %1083 = vmatpush3.bf16.msra.mxu0 %v1082_v46 }
  0x3e   :  { %1084 = vmatprep.subr.bf16.mxu0 %v1232_v0  ;;  %1102 = vmatprep.subr.bf16.mxu1 %v1232_v0 }
  0x40   :  { %888 = vmatmul.mubr.f32.vlgmr.msra.gmra.mrb[0].mxu1 %v1374_v47 }
  0x41   :  { %1086 = vmatpush3.bf16.msra.mxu0 %v1085_v51  ;;  %1104 = vmatpush3.bf16.msra.mxu1 %v1274_v15 }
  0x42   :  { %1087 = vmatprep.subr.bf16.mxu0 %v1232_v0  ;;  %1105 = vmatprep.subr.bf16.mxu1 %v1232_v0 }
  0x43   :  { %957 = vmatprep.mubr.msk.f32.mxu1 %vm1233_vm0, %v1234_v1 }
  0x45   :  { %1089 = vmatpush3.bf16.msra.mxu0 %v1088_v60  ;;  %1107 = vmatpush3.bf16.msra.mxu1 %v1282_v21 }
  0x46   :  { %1090 = vmatprep.subr.bf16.mxu0 %v1232_v0  ;;  %1108 = vmatprep.subr.bf16.mxu1 %v1232_v0 }
  0x49   :  { %1092 = vmatpush3.bf16.msra.mxu0 %v1091_v62  ;;  %1110 = vmatpush3.bf16.msra.mxu1 %v1313_v42 }
  0x4a   :  { %1093 = vmatprep.subr.bf16.mxu0 %v1232_v0  ;;  %1111 = vmatprep.subr.bf16.mxu1 %v1232_v0 }
  0x4d   :  { %1095 = vmatpush3.bf16.msra.mxu0 %v1094_v5  ;;  %1113 = vmatpush3.bf16.msra.mxu1 %v1315_v45 }
  0x4e   :  { %1096 = vmatprep.subr.bf16.mxu0 %v1232_v0  ;;  %1114 = vmatprep.subr.bf16.mxu1 %v1232_v0 }
  0x51   :  { %1098 = vmatpush3.bf16.msra.mxu0 %v1097_v6  ;;  %1116 = vmatpush3.bf16.msra.mxu1 %v1330_v61 }
  0x52   :  { %1099 = vmatprep.subr.bf16.mxu0 %v1232_v0  ;;  %1117 = vmatprep.subr.bf16.mxu1 %v1232_v0 }
  0x55   :  { %1101 = vmatpush3.bf16.msra.mxu0 %v1100_v7  ;;  %1119 = vmatpush3.bf16.msra.mxu1 %v1366_v38 }
  0x56   :  { %1120 = vmatprep.subr.bf16.mxu1 %v1232_v0  ;;  %1126 = vmatprep.subr.bf16.mxu0 %v1232_v0 }
  0x58   :  { %923 = vmatmul.mubr.f32.vlgmr.msra.gmra.mrb[2].mxu0 %v1387_v56 }
  0x59   :  { %1122 = vmatpush3.bf16.msra.mxu1 %v1389_v59  ;;  %1128 = vmatpush3.bf16.msra.mxu0 %v1127_v10 }
  0x5a   :  { %1123 = vmatprep.subr.bf16.mxu1 %v1232_v0  ;;  %1129 = vmatprep.subr.bf16.mxu0 %v1232_v0 }
  0x5b   :  { %992 = vmatprep.mubr.msk.f32.mxu0 %vm1233_vm0, %v1234_v1 }
  0x5d   :  { %1125 = vmatpush3.bf16.msra.mxu1 %v1403_v8  ;;  %1131 = vmatpush3.bf16.msra.mxu0 %v1130_v12 }
  0x5e   :  { %1132 = vmatprep.subr.bf16.mxu0 %v1232_v0  ;;  %1150 = vmatprep.subr.bf16.mxu1 %v1232_v0 }
  0x60   :  { %958 = vmatmul.mubr.f32.vlgmr.msra.gmra.mrb[2].mxu1 %v142_v2 }
  0x61   :  { %1134 = vmatpush3.bf16.msra.mxu0 %v1133_v16  ;;  %1152 = vmatpush3.bf16.msra.mxu1 %v1274_v15  ;;  %v1139_v15 = vpack.c.bf16 %v216_v14, %v209_v11 }
  0x62   :  { %1135 = vmatprep.subr.bf16.mxu0 %v1232_v0  ;;  %1153 = vmatprep.subr.bf16.mxu1 %v1232_v0 }
  0x63   :  { %1027 = vmatprep.mubr.msk.f32.mxu1 %vm1233_vm0, %v1234_v1  ;;  %v1142_v1 = vpack.c.bf16 %v230_v41, %v223_v37 }
  0x65   :  { %1137 = vmatpush3.bf16.msra.mxu0 %v1136_v17  ;;  %1155 = vmatpush3.bf16.msra.mxu1 %v1282_v21  ;;  %v1148_v21 = vpack.c.bf16 %v258_v63, %v251_v3 }
  0x66   :  { %1138 = vmatprep.subr.bf16.mxu0 %v1232_v0  ;;  %1156 = vmatprep.subr.bf16.mxu1 %v1232_v0 }
  0x69   :  { %1140 = vmatpush3.bf16.msra.mxu0 %v1139_v15  ;;  %1158 = vmatpush3.bf16.msra.mxu1 %v1313_v42 }
  0x6a   :  { %1141 = vmatprep.subr.bf16.mxu0 %v1232_v0  ;;  %1159 = vmatprep.subr.bf16.mxu1 %v1232_v0 }
  0x6d   :  { %1143 = vmatpush3.bf16.msra.mxu0 %v1142_v1  ;;  %1161 = vmatpush3.bf16.msra.mxu1 %v1315_v45 }
  0x6e   :  { %1144 = vmatprep.subr.bf16.mxu0 %v1232_v0  ;;  %1162 = vmatprep.subr.bf16.mxu1 %v1232_v0 }
  0x71   :  { %1146 = vmatpush3.bf16.msra.mxu0 %v1145_v18  ;;  %1164 = vmatpush3.bf16.msra.mxu1 %v1330_v61 }
  0x72   :  { %1147 = vmatprep.subr.bf16.mxu0 %v1232_v0  ;;  %1165 = vmatprep.subr.bf16.mxu1 %v1232_v0 }
  0x75   :  { %1149 = vmatpush3.bf16.msra.mxu0 %v1148_v21  ;;  %1167 = vmatpush3.bf16.msra.mxu1 %v1366_v38 }
  0x76   :  { %1168 = vmatprep.subr.bf16.mxu1 %v1232_v0 }
  0x78   :  { %993 = vmatmul.mubr.f32.vlgmr.msra.gmra.mrb[4].mxu0 %v1374_v47 }
  0x79   :  { %1170 = vmatpush3.bf16.msra.mxu1 %v1389_v59 }
  0x7a   :  { %1171 = vmatprep.subr.bf16.mxu1 %v1232_v0  ;;  %v717_v0 = vld [vmem:[%s1547_s2] ss:$0 sm:$0xff] }
  0x7d   :  { %1173 = vmatpush3.bf16.msra.mxu1 %v1403_v8 }
  0x80   :  { %1028 = vmatmul.mubr.f32.vlgmr.msra.gmra.mrb[4].mxu1 %v1374_v47 }
 0x10b   :  { %v146_v22 = vpop.f32.mrb[0].mxu0 }
 0x10c   :  { %v854_v23 = vpop.f32.mrb[1].mxu0 }
 0x113   :  { %v297_v24 = vpop.f32.mrb[0].mxu1 }
 0x114   :  { %v298_v25 = vadd.f32 %v297_v24, %v146_v22  ;;  %v889_v29 = vpop.f32.mrb[1].mxu1 }
 0x12b   :  { %v401_v30 = vpop.f32.mrb[2].mxu0 }
 0x12c   :  { %v402_v32 = vadd.f32 %v401_v30, %v298_v25  ;;  %v924_v35 = vpop.f32.mrb[3].mxu0 }
 0x133   :  { %v490_v36 = vpop.f32.mrb[2].mxu1 }
 0x134   :  { %v491_v42 = vadd.f32 %v490_v36, %v402_v32  ;;  %v959_v45 = vpop.f32.mrb[3].mxu1 }
 0x14b   :  { %v609_v48 = vpop.f32.mrb[4].mxu0 }
 0x14c   :  { %v610_v49 = vadd.f32 %v609_v48, %v491_v42  ;;  %v994_v52 = vpop.f32.mrb[5].mxu0 }
 0x153   :  { %v696_v55 = vpop.f32.mrb[4].mxu1 }
 0x154   :  { %v697_v57 = vadd.f32 %v696_v55, %v610_v49  ;;  %v1029_v58 = vpop.f32.mrb[5].mxu1 }
 0x156   :  { %v700_v61 = vadd.f32 %v717_v0, %v697_v57 }
 0x158   :  { %701 = vst [vmem:[#allocation5] sm:$0xff] %v700_v61 }
 0x159   :  { %1214 = shalt.err (!%p1211_p12)
}
 0x15a   :  { %s1215_s6 = scalar_lea.hbm %s1548_s3, 128 }
 0x15b   :  { %p1216_p13 = scmp.ne.s32.totalorder %s1548_s3, %s1215_s6  ;;  %p1219_p0 = scmp.lt.u32.totalorder %s1215_s6, %s1548_s3 }
 0x15d   :  { %p1221_p1 = pnand %p1219_p0, %p1216_p13 }
 0x15f   :  { %1224 = shalt.err (!%p1221_p1)
}
 0x160   :  { %711 = dma.vmem_to_hbm [thread:$0]  %s709_s29, 128, %s1548_s3, [#allocation4]  }
 0x161   :  { %1227 = dma.done.wait [#allocation4], 128  }
 0x162   :  { %1228 = vsyncadd [#allocation4], 4294967168 }
 0x163   :  { %715 = vsyncpa [#allocation3], 1 }
 0x164   :  { %716 = vsyncpa [#allocation4], 1 }

</bundles_post_ra>
